<compile_context>
chip_gen: v7x
topology: tpu7x:2x2x1
jax: 0.10.0
libtpu: 0.0.40
codegen_flags: <defaults>
</compile_context>

<pallas_src>
import jax
import jax.numpy as jnp
from jax.experimental import pallas as pl
from jax.experimental.pallas import tpu as pltpu

LANE = 128


def _round_up(x, m):
    return (x + m - 1) // m * m


def _vmem_cap_bytes():
    """Physical VMEM per core (v5e/v6e: 128 MiB, v7x: 64 MiB) with ~15% headroom."""
    phys = 64 * 1024 * 1024  # conservative fallback (v7x-sized)
    try:
        phys = int(pltpu.get_tpu_info().vmem_capacity_bytes)
    except Exception:
        pass
    return int(phys * 0.85)


# ----------------------------------------------------------------------------
# Fused Pallas kernel: all L GCN layers in one pallas_call.
#   grid = (L,)  sequential ("arbitrary"): layer l+1 depends on layer l.
#   a_hbm : [Np, Np]     bf16, memory_space=ANY  -> copied once into a_vmem
#   x_hbm : [Np, C]      f32,  memory_space=ANY  -> copied once into h_ref
#   w_ref : [L, C, C]    bf16, constant block index (fully resident)
#   b_ref : [L, 1, C]    f32,  constant block index (fully resident)
#   o_ref : [Np, C]      f32,  written only at the last layer
#   a_vmem: VMEM scratch [Np, Np] bf16  — adjacency, single-buffered, resident
#   h_ref : VMEM scratch [Np, C]  f32   — activation, resident across layers
#   sem   : DMA semaphores (2,)
# ----------------------------------------------------------------------------
def fused_gcn_kernel(a_hbm, x_hbm, w_ref, b_ref, o_ref, a_vmem, h_ref, sem):
    l = pl.program_id(0)
    num_layers = pl.num_programs(0)

    # One-shot manual DMA of the resident operands (single copy each, no pipeline
    # double-buffering).  Both copies issued, then both waited (overlapped).
    @pl.when(l == 0)
    def _():
        cp_a = pltpu.make_async_copy(a_hbm, a_vmem, sem.at[0])
        cp_x = pltpu.make_async_copy(x_hbm, h_ref, sem.at[1])
        cp_a.start()
        cp_x.start()
        cp_a.wait()
        cp_x.wait()

    # Per-layer weight slab / bias row from the resident stacks.
    w_l = w_ref[l]          # [C, C] bf16
    b_l = b_ref[l]          # [1, C] f32

    # Feature transform: bf16 x bf16 on the MXU, f32 accumulation.  G = H @ W_l + b_l
    g = jnp.dot(h_ref[...].astype(jnp.bfloat16), w_l,
                preferred_element_type=jnp.float32)
    g = g + b_l

    # Neighborhood aggregation (dominant matmul): bf16 x bf16, f32 accumulation.
    h = jnp.dot(a_vmem[...], g.astype(jnp.bfloat16),
                preferred_element_type=jnp.float32)

    @pl.when(l < num_layers - 1)
    def _():
        h_ref[...] = jnp.maximum(h, 0.0)      # ReLU on all but the last layer

    @pl.when(l == num_layers - 1)
    def _():
        o_ref[...] = h                         # last layer: no activation


def fused_gcn(a_hat, x_pad, w_stack, b_stack):
    n_pad, c_pad = x_pad.shape
    num_layers = w_stack.shape[0]

    # VMEM accounting (single-buffered A/H scratch; out/W/b auto-pipelined -> x2).
    vmem_need = (
        a_hat.size * a_hat.dtype.itemsize            # A_hat scratch (bf16, 1 copy)
        + 4 * n_pad * c_pad                          # H scratch (f32, 1 copy)
        + 2 * 4 * n_pad * c_pad                      # output block, double-buffered
        + 2 * w_stack.size * w_stack.dtype.itemsize  # W stack, double-buffered
        + 2 * 4 * num_layers * 8 * c_pad             # b stack (sublane-padded), x2
    )
    vmem_limit = int(min(max(int(1.3 * vmem_need) + (2 << 20), 8 << 20),
                         _vmem_cap_bytes()))

    return pl.pallas_call(
        fused_gcn_kernel,
        out_shape=jax.ShapeDtypeStruct((n_pad, c_pad), jnp.float32),
        grid=(num_layers,),
        in_specs=[
            pl.BlockSpec(memory_space=pl.ANY),                        # A_hat (HBM)
            pl.BlockSpec(memory_space=pl.ANY),                        # X     (HBM)
            pl.BlockSpec((num_layers, c_pad, c_pad),
                         lambda l: (0, 0, 0)),                        # W stack, resident
            pl.BlockSpec((num_layers, 1, c_pad),
                         lambda l: (0, 0, 0)),                        # b stack, resident
        ],
        out_specs=pl.BlockSpec((n_pad, c_pad), lambda l: (0, 0)),
        scratch_shapes=[
            pltpu.VMEM((n_pad, n_pad), jnp.bfloat16),                 # a_vmem
            pltpu.VMEM((n_pad, c_pad), jnp.float32),                  # h_ref
            pltpu.SemaphoreType.DMA((2,)),
        ],
        compiler_params=pltpu.CompilerParams(
            dimension_semantics=("arbitrary",),
            vmem_limit_bytes=vmem_limit,
        ),
    )(a_hat, x_pad, w_stack, b_stack)


# ----------------------------------------------------------------------------
# Plain-JAX glue: dense normalized adjacency (PyG gcn_norm semantics), bf16,
# zero-padded to [Np, Np].  Build ONCE per mesh and reuse across forward calls.
# ----------------------------------------------------------------------------
def build_norm_adj_padded(edge_index, num_nodes, n_pad, dtype=jnp.bfloat16):
    src = edge_index[0]
    dst = edge_index[1]
    a = jnp.zeros((num_nodes, num_nodes), jnp.float32).at[dst, src].add(1.0)
    # gcn_norm uses add_remaining_self_loops: existing self-loop edges are dropped
    # and every node receives exactly one weight-1 self loop (duplicate non-self
    # edges still accumulate) -> force the diagonal to 1.0.
    diag = jnp.arange(num_nodes)
    a = a.at[diag, diag].set(1.0)
    deg = a.sum(axis=1)
    d_inv_sqrt = jnp.where(deg > 0.0, jax.lax.rsqrt(deg), 0.0)
    a = (d_inv_sqrt[:, None] * a * d_inv_sqrt[None, :]).astype(dtype)
    return jnp.pad(a, ((0, n_pad - num_nodes), (0, n_pad - num_nodes)))


# ----------------------------------------------------------------------------
# Forward.  `a_hat_pad` should be precomputed once per mesh (steady-state path);
# if None it is built here (cold path).
# ----------------------------------------------------------------------------
def mesh_gcn_forward(data, params, a_hat_pad=None):
    """data: dict with x [N, Cx], saf [N, 1], dsdf [N, 1], edge_index [2, E], aoa [B]."""
    n = data["x"].shape[0]
    # torch.cat([data.x, data.saf, data.dsdf], dim=1)
    x = jnp.concatenate([data["x"], data["saf"], data["dsdf"]], axis=1)
    x = x.astype(jnp.float32)
    c_out = params[-1][0].shape[1]

    # Pad nodes / features for lane- and sublane-dense tiles (exact: pads stay zero).
    # NOTE: if hidden_channels ever exceeds 128, pad C to a multiple of 256 on
    # v6e/v7x to fill the 256-wide MXU (128 is already full width on v5e).
    n_pad = _round_up(n, LANE)
    c_max = max(max(w.shape[0] for w, _ in params),
                max(w.shape[1] for w, _ in params))
    c_pad = _round_up(max(c_max, LANE), LANE)

    if a_hat_pad is None:
        a_hat_pad = build_norm_adj_padded(data["edge_index"], n, n_pad)

    x_pad = jnp.pad(x, ((0, n_pad - n), (0, c_pad - x.shape[1])))

    w_stack = jnp.stack(
        [jnp.pad(w, ((0, c_pad - w.shape[0]), (0, c_pad - w.shape[1])))
         for w, _ in params]).astype(jnp.bfloat16)               # [L, C, C] bf16
    b_stack = jnp.stack(
        [jnp.pad(b.reshape(1, -1), ((0, 0), (0, c_pad - b.size)))
         for _, b in params]).astype(jnp.float32)                # [L, 1, C] f32

    out_pad = fused_gcn(a_hat_pad, x_pad, w_stack, b_stack)
    return out_pad[:n, :c_out]


# ----------------------------------------------------------------------------
# Deterministic parameter init (glorot weights, zero bias — GCNConv defaults)
# ----------------------------------------------------------------------------
def init_params(key, in_channels, hidden_channels, out_channels, num_layers):
    in_channels = in_channels + 1  # cat([x, saf, dsdf]) adds one channel net
    channels = [in_channels] + [hidden_channels] * (num_layers - 1) + [out_channels]
    params = []
    for i in range(num_layers):
        key, wk = jax.random.split(key)
        fan_in, fan_out = channels[i], channels[i + 1]
        limit = jnp.sqrt(6.0 / (fan_in + fan_out))
        w = jax.random.uniform(wk, (fan_in, fan_out), jnp.float32, -limit, limit)
        b = jnp.zeros((fan_out,), jnp.float32)
        params.append((w, b))
    return params


if __name__ == "__main__":
    key = jax.random.PRNGKey(0)

    # Small, module-consistent shapes.
    num_nodes = 256
    num_edges = 1024
    in_channels = 4        # data.x carries in_channels - 1 features; +saf +dsdf
    hidden_channels = 32
    out_channels = 3
    num_layers = 6
    batch_size = 2         # data.aoa.shape[0] (only used for batch_size in torch code)

    k_x, k_saf, k_dsdf, k_e, k_p = jax.random.split(key, 5)
    data = {
        "x": jax.random.normal(k_x, (num_nodes, in_channels - 1), jnp.float32),
        "saf": jax.random.normal(k_saf, (num_nodes, 1), jnp.float32),
        "dsdf": jax.random.normal(k_dsdf, (num_nodes, 1), jnp.float32),
        "edge_index": jax.random.randint(k_e, (2, num_edges), 0, num_nodes, jnp.int32),
        "aoa": jnp.zeros((batch_size,), jnp.float32),
    }

    params = init_params(k_p, in_channels, hidden_channels, out_channels, num_layers)

    # Adjacency precomputed once per mesh (hoisted out of the per-call path).
    n_pad = _round_up(num_nodes, LANE)
    a_hat_pad = build_norm_adj_padded(data["edge_index"], num_nodes, n_pad)
    a_hat_pad = jax.block_until_ready(a_hat_pad)

    out = mesh_gcn_forward(data, params, a_hat_pad=a_hat_pad)
    out = jax.block_until_ready(out)
    assert out.shape == (num_nodes, out_channels), out.shape
    assert bool(jnp.all(jnp.isfinite(out))), "non-finite output"
    print("KERNEL_OK")
</pallas_src>

<mosaic_0001>
module attributes {stable_mosaic.version = 11 : i64} {
  func.func @fused_gcn_kernel(%arg0: i32, %arg1: memref<256x256xbf16, #tpu.memory_space<any>>, %arg2: memref<256x128xf32, #tpu.memory_space<any>>, %arg3: memref<6x128x128xbf16, #tpu.memory_space<vmem>>, %arg4: memref<6x1x128xf32, #tpu.memory_space<vmem>>, %arg5: memref<256x128xf32, #tpu.memory_space<vmem>>, %arg6: memref<256x256xbf16, #tpu.memory_space<vmem>>, %arg7: memref<256x128xf32, #tpu.memory_space<vmem>>, %arg8: memref<2x!tpu.dma_semaphore, #tpu.memory_space<semaphore_mem>>) attributes {dimension_semantics = [#tpu.dimension_semantics<arbitrary>], iteration_bounds = array<i64: 6>, scalar_prefetch = 0 : i64, scratch_operands = 3 : i64, tpu.core_type = #tpu.core_type<tc>, window_params = [{}, {}, {pipeline_mode = #tpu.pipeline_mode<synchronous>, transform_indices = @transform_2, window_bounds = array<i64: 6, 128, 128>}, {pipeline_mode = #tpu.pipeline_mode<synchronous>, transform_indices = @transform_3, window_bounds = array<i64: 6, 1, 128>}, {pipeline_mode = #tpu.pipeline_mode<synchronous>, transform_indices = @transform_4, window_bounds = array<i64: 256, 128>}]} {
    %c0_i32 = arith.constant 0 : i32
    %0 = arith.cmpi eq, %arg0, %c0_i32 : i32
    %1 = arith.extui %0 : i1 to i32
    %c0_i32_0 = arith.constant 0 : i32
    %2 = arith.cmpi ne, %1, %c0_i32_0 : i32
    scf.if %2 {
      %c0_i32_12 = arith.constant 0 : i32
      %23 = tpu.memref_slice %arg8[%c0_i32_12] : memref<2x!tpu.dma_semaphore, #tpu.memory_space<semaphore_mem>> -> memref<1x!tpu.dma_semaphore, #tpu.memory_space<semaphore_mem>>
      %24 = tpu.memref_squeeze %23 : memref<1x!tpu.dma_semaphore, #tpu.memory_space<semaphore_mem>> -> memref<!tpu.dma_semaphore, #tpu.memory_space<semaphore_mem>>
      tpu.enqueue_dma source(%arg1 : memref<256x256xbf16, #tpu.memory_space<any>>) target(%arg6 : memref<256x256xbf16, #tpu.memory_space<vmem>>) target_semaphore(%24 : memref<!tpu.dma_semaphore, #tpu.memory_space<semaphore_mem>>)
      %c1_i32 = arith.constant 1 : i32
      %25 = tpu.memref_slice %arg8[%c1_i32] : memref<2x!tpu.dma_semaphore, #tpu.memory_space<semaphore_mem>> -> memref<1x!tpu.dma_semaphore, #tpu.memory_space<semaphore_mem>>
      %26 = tpu.memref_squeeze %25 : memref<1x!tpu.dma_semaphore, #tpu.memory_space<semaphore_mem>> -> memref<!tpu.dma_semaphore, #tpu.memory_space<semaphore_mem>>
      tpu.enqueue_dma source(%arg2 : memref<256x128xf32, #tpu.memory_space<any>>) target(%arg7 : memref<256x128xf32, #tpu.memory_space<vmem>>) target_semaphore(%26 : memref<!tpu.dma_semaphore, #tpu.memory_space<semaphore_mem>>)
      %c0_i32_13 = arith.constant 0 : i32
      %27 = tpu.memref_slice %arg8[%c0_i32_13] : memref<2x!tpu.dma_semaphore, #tpu.memory_space<semaphore_mem>> -> memref<1x!tpu.dma_semaphore, #tpu.memory_space<semaphore_mem>>
      %28 = tpu.memref_squeeze %27 : memref<1x!tpu.dma_semaphore, #tpu.memory_space<semaphore_mem>> -> memref<!tpu.dma_semaphore, #tpu.memory_space<semaphore_mem>>
      tpu.wait_dma2 semaphore(%28 : memref<!tpu.dma_semaphore, #tpu.memory_space<semaphore_mem>>) src(%arg1 : memref<256x256xbf16, #tpu.memory_space<any>>) dst(%arg6 : memref<256x256xbf16, #tpu.memory_space<vmem>>)
      %c1_i32_14 = arith.constant 1 : i32
      %29 = tpu.memref_slice %arg8[%c1_i32_14] : memref<2x!tpu.dma_semaphore, #tpu.memory_space<semaphore_mem>> -> memref<1x!tpu.dma_semaphore, #tpu.memory_space<semaphore_mem>>
      %30 = tpu.memref_squeeze %29 : memref<1x!tpu.dma_semaphore, #tpu.memory_space<semaphore_mem>> -> memref<!tpu.dma_semaphore, #tpu.memory_space<semaphore_mem>>
      tpu.wait_dma2 semaphore(%30 : memref<!tpu.dma_semaphore, #tpu.memory_space<semaphore_mem>>) src(%arg2 : memref<256x128xf32, #tpu.memory_space<any>>) dst(%arg7 : memref<256x128xf32, #tpu.memory_space<vmem>>)
    } else {
    }
    %3 = arith.index_cast %arg0 : i32 to index
    %c0 = arith.constant 0 : index
    %c0_1 = arith.constant 0 : index
    %4 = vector.load %arg3[%3, %c0, %c0_1] : memref<6x128x128xbf16, #tpu.memory_space<vmem>>, vector<1x128x128xbf16>
    %5 = vector.shape_cast %4 : vector<1x128x128xbf16> to vector<128x128xbf16>
    %6 = arith.index_cast %arg0 : i32 to index
    %c0_2 = arith.constant 0 : index
    %c0_3 = arith.constant 0 : index
    %7 = vector.load %arg4[%6, %c0_2, %c0_3] : memref<6x1x128xf32, #tpu.memory_space<vmem>>, vector<1x1x128xf32>
    %8 = vector.shape_cast %7 : vector<1x1x128xf32> to vector<1x128xf32>
    %c0_4 = arith.constant 0 : index
    %c0_5 = arith.constant 0 : index
    %9 = vector.load %arg7[%c0_4, %c0_5] : memref<256x128xf32, #tpu.memory_space<vmem>>, vector<256x128xf32>
    %10 = arith.truncf %9 : vector<256x128xf32> to vector<256x128xbf16>
    %cst = arith.constant dense<0.000000e+00> : vector<256x128xf32>
    %11 = tpu.matmul %10, %5, %cst {dimension_numbers = #tpu.dot_dimension_numbers<[1], [0], [0], [1], [0, 0, 1, 1], [], []>} : vector<256x128xbf16>, vector<128x128xbf16>, vector<256x128xf32> -> vector<256x128xf32>
    %12 = vector.broadcast %8 : vector<1x128xf32> to vector<256x128xf32>
    %13 = arith.addf %11, %12 : vector<256x128xf32>
    %c0_6 = arith.constant 0 : index
    %c0_7 = arith.constant 0 : index
    %14 = vector.load %arg6[%c0_6, %c0_7] : memref<256x256xbf16, #tpu.memory_space<vmem>>, vector<256x256xbf16>
    %15 = arith.truncf %13 : vector<256x128xf32> to vector<256x128xbf16>
    %cst_8 = arith.constant dense<0.000000e+00> : vector<256x128xf32>
    %16 = tpu.matmul %14, %15, %cst_8 {dimension_numbers = #tpu.dot_dimension_numbers<[1], [0], [0], [1], [0, 0, 1, 1], [], []>} : vector<256x256xbf16>, vector<256x128xbf16>, vector<256x128xf32> -> vector<256x128xf32>
    %c5_i32 = arith.constant 5 : i32
    %17 = arith.cmpi slt, %arg0, %c5_i32 : i32
    %18 = arith.extui %17 : i1 to i32
    %c0_i32_9 = arith.constant 0 : i32
    %19 = arith.cmpi ne, %18, %c0_i32_9 : i32
    scf.if %19 {
      %cst_12 = arith.constant 0.000000e+00 : f32
      %23 = vector.broadcast %cst_12 : f32 to vector<256x128xf32>
      %24 = arith.maximumf %16, %23 : vector<256x128xf32>
      %c0_13 = arith.constant 0 : index
      %c0_14 = arith.constant 0 : index
      %25 = vector.load %arg7[%c0_13, %c0_14] : memref<256x128xf32, #tpu.memory_space<vmem>>, vector<256x128xf32>
      tpu.vector_store %arg7[%c0_13, %c0_14], %24 {strides = array<i32>} : memref<256x128xf32, #tpu.memory_space<vmem>>, vector<256x128xf32>,
    } else {
    }
    %c5_i32_10 = arith.constant 5 : i32
    %20 = arith.cmpi eq, %arg0, %c5_i32_10 : i32
    %21 = arith.extui %20 : i1 to i32
    %c0_i32_11 = arith.constant 0 : i32
    %22 = arith.cmpi ne, %21, %c0_i32_11 : i32
    scf.if %22 {
      %c0_12 = arith.constant 0 : index
      %c0_13 = arith.constant 0 : index
      %23 = vector.load %arg5[%c0_12, %c0_13] : memref<256x128xf32, #tpu.memory_space<vmem>>, vector<256x128xf32>
      tpu.vector_store %arg5[%c0_12, %c0_13], %16 {strides = array<i32>} : memref<256x128xf32, #tpu.memory_space<vmem>>, vector<256x128xf32>,
    } else {
    }
    return
  }
  func.func @transform_2(%arg0: i32) -> (i32, i32, i32) {
    %c0_i32 = arith.constant 0 : i32
    %c0_i32_0 = arith.constant 0 : i32
    %c0_i32_1 = arith.constant 0 : i32
    %c0_i32_2 = arith.constant 0 : i32
    return %c0_i32, %c0_i32_0, %c0_i32_1 : i32, i32, i32
  }
  func.func @transform_3(%arg0: i32) -> (i32, i32, i32) {
    %c0_i32 = arith.constant 0 : i32
    %c0_i32_0 = arith.constant 0 : i32
    %c0_i32_1 = arith.constant 0 : i32
    %c0_i32_2 = arith.constant 0 : i32
    return %c0_i32, %c0_i32_0, %c0_i32_1 : i32, i32, i32
  }
  func.func @transform_4(%arg0: i32) -> (i32, i32) {
    %c0_i32 = arith.constant 0 : i32
    %c0_i32_0 = arith.constant 0 : i32
    %c0_i32_1 = arith.constant 0 : i32
    return %c0_i32, %c0_i32_0 : i32, i32
  }
}

</mosaic_0001>

<bundles_post_ra>
// kernel: tpu_custom_call.1
= control target key start
LH: loop header
LB: loop body
LE: loop exit
PB: predicated region body
PF: predicated region fallthrough
CT: control target
= control target key end

     0   :  { %9 = vsyncpa [#allocation6], 0  ;;  %s1589_s0 = inlined_call_operand.hbm [shape: bf16[256,256], index: 0, kind: input, shape index: {}]   ;;  %s1590_s1 = inlined_call_operand.hbm [shape: f32[256,128], index: 1, kind: input, shape index: {}]   ;;  %s1591_s2 = inlined_call_operand.hbm [shape: bf16[6,128,128], index: 2, kind: input, shape index: {}]   ;;  %s1592_s3 = inlined_call_operand.vmem [shape: f32[6,1,128], index: 3, kind: input, shape index: {}]   ;;  %s1593_s4 = inlined_call_operand.hbm [shape: f32[256,128], index: 4, kind: output, shape index: {}]  }
   0x1   :  { %10 = vsyncpa [#allocation7], 0  ;;  %s1282_s15 = smov 0  }
   0x2 LB: > { %s1288_s16 = sadd.s32 4294967295, %s1240_s15   ;;  %p848_p0 = scmp.ge.s32.totalorder %s1240_s15, 1  ;;  %s1240_s15 = sphi %s1282_s15, %s16_s15  }
   0x3   : > { %p84_p1 = scmp.lt.s32.totalorder %s1240_s15, 7  ;;  %s1242_s17 = smov [#allocation5]  }
   0x4   : > { %s96_s18 = sshll.u32 %s1242_s17, 4  ;;  %p1594_p3 = scmp.eq.s32.totalorder %s1288_s16, 0  ;;  %s97_s18 = int_to_ptr.vmem [resolvable:$true] %s96_s18 }
   0x5   : > { %p1292_p2 = pnand %p848_p0, %p84_p1  ;;  %s1138_s23 = scalar_lea.hbm %s1591_s2, 6144 }
   0x6   : > { %p1139_p6 = scmp.ne.s32.totalorder %s1591_s2, %s1138_s23  ;;  %p1145_p10 = scmp.lt.u32.totalorder %s1138_s23, %s1591_s2 }
   0x7   : > { %s1596_s19 = scalar_select %p1292_p2, 1, 0 }
   0x8   : > { %p1098_p4 = pneg %p1292_p2 }
   0xa   : > { %p1301_p5 = pnand %p1594_p3, %p1098_p4 }
   0xc   : > { %p1140_p7 = pneg %p1301_p5 }
   0xe   : > { %p1141_p8 = pnand %p1140_p7, %p1139_p6 }
  0x10   : > { %p1142_p9 = pneg %p1141_p8 }
  0x12   : > { %p1147_p11 = pnand %p1145_p10, %p1142_p9 }
  0x14   : > { %1150 = shalt.err (!%p1147_p11)
}
  0x15   : > { %s1151_s28 = scalar_lea.vmem %s97_s18, 6144  ;;  %p1159_p1 = scmp.lt.s32.totalorder %s97_s18, %s97_s18 }
  0x16   : > { %p1152_p12 = scmp.ne.s32.totalorder %s97_s18, %s1151_s28  ;;  %p1160_p4 = scmp.lt.s32.totalorder %s1151_s28, %s1151_s28 }
  0x18   : > { %p1154_p13 = pnand %p1152_p12, %p1140_p7  ;;  %p1161_p3 = por %p1160_p4, %p1159_p1 }
  0x1a   : > { %p1155_p0 = pneg %p1154_p13 }
  0x1c   : > { %p1162_p2 = pnand %p1161_p3, %p1155_p0 }
  0x1e   : > { %1165 = shalt.err (!%p1162_p2)
}
  0x1f   : > { %s1243_s29 = smov 64   ;;  %s1244_s30 = smov 4  }
  0x20   : > { %1101 = dma.hbm_to_vmem [thread:$0]  (!%p1301_p5), %s1591_s2, 6144, %s97_s18, [#allocation6], %s1243_s29, %s1243_s29, %s1244_s30  }
  0x21   : > { %p1598_p6 = scmp.ne.s32.totalorder %s1596_s19, 0 }
  0x22   : > { %p1599_p8 = scmp.eq.s32.totalorder (!%p1598_p6), %s1288_s16, 0 }
  0x23   : > { %115 = sbr.rel (%p1598_p6) target bundleno = 762 (0x2fa), region = 28 }
  0x2a   : > { %1223 = dma.done.wait (%p1599_p8), [#allocation6], 6144   ;;  %p1600_p7 = pmov %p1599_p8 }
  0x2c   : > { %1225 = vsyncadd (%p1600_p7), [#allocation6], 4294961152 }
  0x2d   : > { %p1601_p3 = pmov %p1600_p7  ;;  %s1245_s9 = smov [#allocation2]  }
  0x2e   : > { %s144_s10 = sshll.u32 %s1245_s9, 4  ;;  %s1246_s11 = smov 256   ;;  %s145_s10 = int_to_ptr.vmem [resolvable:$true] %s144_s10 }
  0x2f   : > { %s1080_s7 = scalar_select %p1601_p3, [#allocation0], [#allocation15] }
  0x30   : > { %p1602_p2 = pmov %p1601_p3  ;;  %s1247_s12 = smov 2  }
  0x31   : > { %s136_s8 = sld [smem:[%s1080_s7]]   ;;  %s1248_s13 = smov 64  }
  0x32   : > { %1081 = sst [smem:[#allocation10]] (%p1602_p2), %s1246_s11  ;;  %p1603_p5 = pmov %p1602_p2 }
  0x33   : > { %p1604_p9 = pmov %p1602_p2  ;;  %p1605_p10 = pmov %p1602_p2 }
  0x34   : > { %1082 = sst [smem:[#allocation10 + $0x1]] (%p1603_p5), %s1246_s11  ;;  %s1249_s14 = smov 128  }
  0x35   : > { %1083 = sst [smem:[#allocation10 + $0x2]] (%p1604_p9), %s1247_s12  ;;  %p1606_p11 = pmov %p1602_p2 }
  0x36   : > { %1084 = sst [smem:[#allocation10 + $0x3]] (%p1605_p10), %s1248_s13  ;;  %p1607_p12 = pmov %p1602_p2 }
  0x37   : > { %1085 = sst [smem:[#allocation10 + $0x4]] (%p1606_p11), %s1249_s14  ;;  %s853_s17 = sshll.u32 %s136_s8, 26 }
  0x38   : > { %1086 = sst [smem:[#allocation10 + $0x5]] (%p1607_p12), %s1247_s12  ;;  %s854_s18 = sadd.s32 134217728, %s853_s17 }
  0x39   : > { %p1608_p13 = pmov %p1602_p2  ;;  %p1609_p0 = pmov %p1602_p2 }
  0x3a   : > { %s1250_s19 = smov 4   ;;  %s1251_s20 = smov [#allocation4]  }
  0x3b   : > { %1087 = sst [smem:[#allocation10 + $0x6]] (%p1608_p13), %s1249_s14  ;;  %p1610_p1 = pmov %p1609_p0 }
  0x3c   : > { %1088 = sst [smem:[#allocation10 + $0x7]] (%p1609_p0), %s1248_s13  ;;  %s1252_s21 = smov [#allocation9]  }
  0x3d   : > { %1089 = sst [smem:[#allocation10 + $0x8]] (%p1610_p1), %s1250_s19  ;;  %p1611_p4 = pmov %p1609_p0 }
  0x3e   : > { %s1253_s24 = smov [#allocation3]   ;;  %s1166_s28 = scalar_lea.hbm %s1590_s1, 4096 }
  0x3f   : > { %1090 = dma.general (%p1611_p4), %s1589_s0, 4096, %s145_s10, %s1251_s20, %s1252_s21, [#allocation10], %s854_s18, 0  }
  0x40   : > { %s175_s25 = sshll.u32 %s1253_s24, 4  ;;  %p1167_p6 = scmp.ne.s32.totalorder %s1590_s1, %s1166_s28  ;;  %s176_s25 = int_to_ptr.vmem [resolvable:$true] %s175_s25 }
  0x41   : > { %p1612_p8 = pmov %p1609_p0  ;;  %p1172_p2 = scmp.lt.u32.totalorder %s1166_s28, %s1590_s1 }
  0x43   : > { %p1168_p7 = pnand %p1167_p6, %p1612_p8 }
  0x45   : > { %p1169_p3 = pneg %p1168_p7 }
  0x47   : > { %p1174_p5 = pnand %p1172_p2, %p1169_p3 }
  0x49   : > { %1177 = shalt.err (!%p1174_p5)  }
  0x4a   : > { %s1178_s7 = scalar_lea.vmem %s176_s25, 4096  ;;  %p1613_p10 = pmov %p1609_p0 }
  0x4b   : > { %p1179_p9 = scmp.ne.s32.totalorder %s176_s25, %s1178_s7  ;;  %p1185_p13 = scmp.lt.s32.totalorder %s176_s25, %s176_s25 }
  0x4c   : > { %p1186_p0 = scmp.lt.s32.totalorder %s1178_s7, %s1178_s7 }
  0x4d   : > { %p1180_p11 = pnand %p1179_p9, %p1613_p10 }
  0x4e   : > { %p1187_p1 = por %p1186_p0, %p1185_p13 }
  0x4f   : > { %p1181_p12 = pneg %p1180_p11 }
  0x51   : > { %p1188_p4 = pnand %p1187_p1, %p1181_p12 }
  0x53   : > { %1191 = shalt.err (!%p1188_p4)  }
  0x54   : > { %p1614_p6 = pmov %p1612_p8 }
  0x56   : > { %1091 = dma.hbm_to_vmem [thread:$0]  (%p1614_p6), %s1590_s1, 4096, %s176_s25, [#allocation4 + $0x1] }
  0x57   : > { %p1615_p8 = pmov %p1614_p6 }
  0x58   : > { %p1616_p7 = pmov %p1614_p6 }
  0x59   : > { %1227 = dma.done.wait (%p1615_p8), [#allocation4], 4096 }
  0x5a   : > { %1229 = vsyncadd (%p1616_p7), [#allocation4], 4294963200  ;;  %p1617_p3 = pmov %p1614_p6 }
  0x5c   : > { %1231 = dma.done.wait (%p1617_p3), [#allocation4 + $0x1], 4096  ;;  %p1618_p2 = pmov %p1617_p3 }
  0x5d   : > { %s874_s10 = sshll.u32 %s1288_s16, 6  ;;  %v207_v0 = vld [vmem:[#allocation3] sm:$0xff]  ;;  %v208_v1 = vld [vmem:[#allocation3 + $0x8] sm:$0xff]  ;;  %v209_v11 = vld [vmem:[#allocation3 + $0x10] sm:$0xff]  ;;  %s205_s14 = scalar_lea.vmem %s1592_s3, %s1288_s16 }
  0x5e   : > { %1233 = vsyncadd (%p1618_p2), [#allocation4 + $0x1], 4294963200  ;;  %v239_v2 = vpack.c.bf16 %v208_v1, %v207_v0  ;;  %s188_s11 = scalar_lea.vmem [#allocation5], %s874_s10  ;;  %v210_v12 = vld [vmem:[#allocation3 + $0x18] sm:$0xff]  ;;  %v211_v13 = vld [vmem:[#allocation3 + $0x20] sm:$0xff]  ;;  %p866_p5 = scmp.ge.s32.totalorder %s1288_s16, 5 }
  0x5f   : > { %v1130_v3 = vld [vmem:[%s188_s11] sm:$0xff]   ;;  %v1131_v4 = vld [vmem:[%s188_s11 + $0x8] sm:$0xff]   ;;  %v1132_v5 = vld [vmem:[%s188_s11 + $0x10] sm:$0xff]   ;;  %v240_v15 = vpack.c.bf16 %v210_v12, %v209_v11 }
  0x60   : > { %1027 = vmatprep.mubr.bf16.mxu0 %v239_v2  ;;  %1011 = vmatprep.subr.bf16.mxu0 %v1130_v3  ;;  %v1133_v6 = vld [vmem:[%s188_s11 + $0x18] sm:$0xff]   ;;  %v1134_v7 = vld [vmem:[%s188_s11 + $0x20] sm:$0xff]   ;;  %v1135_v8 = vld [vmem:[%s188_s11 + $0x28] sm:$0xff]  }
  0x61   : > { %1012 = vmatpush3.bf16.msra.mxu0 %v1130_v3  ;;  %v1136_v9 = vld [vmem:[%s188_s11 + $0x30] sm:$0xff]   ;;  %v1137_v10 = vld [vmem:[%s188_s11 + $0x38] sm:$0xff]   ;;  %v212_v14 = vld [vmem:[#allocation3 + $0x28] sm:$0xff] }
  0x62   : > { %1013 = vmatprep.subr.bf16.mxu0 %v1131_v4  ;;  %v241_v16 = vpack.c.bf16 %v212_v14, %v211_v13  ;;  %v213_v17 = vld [vmem:[#allocation3 + $0x30] sm:$0xff]  ;;  %v214_v18 = vld [vmem:[#allocation3 + $0x38] sm:$0xff]  ;;  %v215_v19 = vld [vmem:[#allocation3 + $0x40] sm:$0xff] }
  0x63   : > { %v216_v20 = vld [vmem:[#allocation3 + $0x48] sm:$0xff]  ;;  %v242_v21 = vpack.c.bf16 %v214_v18, %v213_v17  ;;  %v217_v23 = vld [vmem:[#allocation3 + $0x50] sm:$0xff]  ;;  %v218_v24 = vld [vmem:[#allocation3 + $0x58] sm:$0xff] }
  0x64   : > { %v243_v22 = vpack.c.bf16 %v216_v20, %v215_v19  ;;  %v219_v25 = vld [vmem:[#allocation3 + $0x60] sm:$0xff]  ;;  %v220_v26 = vld [vmem:[#allocation3 + $0x68] sm:$0xff]  ;;  %v244_v27 = vpack.c.bf16 %v218_v24, %v217_v23  ;;  %v221_v29 = vld [vmem:[#allocation3 + $0x70] sm:$0xff] }
  0x65   : > { %1014 = vmatpush3.bf16.msra.mxu0 %v1131_v4  ;;  %v245_v28 = vpack.c.bf16 %v220_v26, %v219_v25  ;;  %v222_v30 = vld [vmem:[#allocation3 + $0x78] sm:$0xff]  ;;  %v223_v31 = vld [vmem:[#allocation3 + $0x80] sm:$0xff]  ;;  %v224_v32 = vld [vmem:[#allocation3 + $0x88] sm:$0xff] }
  0x66   : > { %1015 = vmatprep.subr.bf16.mxu0 %v1132_v5  ;;  %v246_v33 = vpack.c.bf16 %v222_v30, %v221_v29  ;;  %v247_v34 = vpack.c.bf16 %v224_v32, %v223_v31  ;;  %v225_v35 = vld [vmem:[#allocation3 + $0x90] sm:$0xff]  ;;  %v226_v36 = vld [vmem:[#allocation3 + $0x98] sm:$0xff]  ;;  %v227_v37 = vld [vmem:[#allocation3 + $0xa0] sm:$0xff] }
  0x67   : > { %v228_v38 = vld [vmem:[#allocation3 + $0xa8] sm:$0xff]  ;;  %v248_v39 = vpack.c.bf16 %v226_v36, %v225_v35  ;;  %v229_v41 = vld [vmem:[#allocation3 + $0xb0] sm:$0xff]  ;;  %v230_v42 = vld [vmem:[#allocation3 + $0xb8] sm:$0xff] }
  0x68   : > { %v249_v40 = vpack.c.bf16 %v228_v38, %v227_v37  ;;  %v231_v43 = vld [vmem:[#allocation3 + $0xc0] sm:$0xff]  ;;  %v232_v44 = vld [vmem:[#allocation3 + $0xc8] sm:$0xff]  ;;  %v250_v45 = vpack.c.bf16 %v230_v42, %v229_v41  ;;  %v233_v47 = vld [vmem:[#allocation3 + $0xd0] sm:$0xff] }
  0x69   : > { %1016 = vmatpush3.bf16.msra.mxu0 %v1132_v5  ;;  %v251_v46 = vpack.c.bf16 %v232_v44, %v231_v43  ;;  %v234_v48 = vld [vmem:[#allocation3 + $0xd8] sm:$0xff]  ;;  %v235_v49 = vld [vmem:[#allocation3 + $0xe0] sm:$0xff]  ;;  %v236_v50 = vld [vmem:[#allocation3 + $0xe8] sm:$0xff] }
  0x6a   : > { %1017 = vmatprep.subr.bf16.mxu0 %v1133_v6  ;;  %v252_v51 = vpack.c.bf16 %v234_v48, %v233_v47  ;;  %v253_v52 = vpack.c.bf16 %v236_v50, %v235_v49  ;;  %v237_v53 = vld [vmem:[#allocation3 + $0xf0] sm:$0xff]  ;;  %v238_v54 = vld [vmem:[#allocation3 + $0xf8] sm:$0xff]  ;;  %v479_v56 = vld [vmem:[#allocation2 + $0x48] sm:$0xff] }
  0x6b   : > { %v254_v55 = vpack.c.bf16 %v238_v54, %v237_v53  ;;  %582 = vmatprep.mubr.bf16.mxu1 %v479_v56  ;;  %v1383_v58 = vld [vmem:[%s205_s14] ss:$0 sm:$0xff]  ;;  %v471_v59 = vld [vmem:[#allocation2 + $0x8] sm:$0xff] }
  0x6d   : > { %1018 = vmatpush3.bf16.msra.mxu0 %v1133_v6 }
  0x6e   : > { %1019 = vmatprep.subr.bf16.mxu0 %v1134_v7 }
  0x71   : > { %1020 = vmatpush3.bf16.msra.mxu0 %v1134_v7 }
  0x72   : > { %1021 = vmatprep.subr.bf16.mxu0 %v1135_v8 }
  0x75   : > { %1022 = vmatpush3.bf16.msra.mxu0 %v1135_v8 }
  0x76   : > { %1023 = vmatprep.subr.bf16.mxu0 %v1136_v9 }
  0x79   : > { %1024 = vmatpush3.bf16.msra.mxu0 %v1136_v9 }
  0x7a   : > { %1025 = vmatprep.subr.bf16.mxu0 %v1137_v10 }
  0x7d   : > { %1026 = vmatpush3.bf16.msra.mxu0 %v1137_v10 }
  0x80   : > { %1028 = vmatmul.mubr.bf16.vlgmr.msra.gmra.mrb[0].mxu0 %v240_v15 }
  0x81   : > { %1031 = vmatprep.mubr.bf16.mxu0 %v241_v16 }
  0x88   : > { %1032 = vmatmul.mubr.bf16.gmra.mrb[4].mxu0 %v242_v21 }
  0x89   : > { %1035 = vmatprep.mubr.bf16.mxu0 %v243_v22 }
  0x90   : > { %1036 = vmatmul.mubr.bf16.gmra.mrb[8].mxu0 %v244_v27 }
  0x91   : > { %1039 = vmatprep.mubr.bf16.mxu0 %v245_v28 }
  0x98   : > { %1040 = vmatmul.mubr.bf16.gmra.mrb[12].mxu0 %v246_v33 }
  0x99   : > { %1043 = vmatprep.mubr.bf16.mxu0 %v247_v34 }
  0xa0   : > { %1044 = vmatmul.mubr.bf16.gmra.mrb[16].mxu0 %v248_v39 }
  0xa1   : > { %1047 = vmatprep.mubr.bf16.mxu0 %v249_v40 }
  0xa8   : > { %1048 = vmatmul.mubr.bf16.gmra.mrb[20].mxu0 %v250_v45 }
  0xa9   : > { %1051 = vmatprep.mubr.bf16.mxu0 %v251_v46 }
  0xb0   : > { %1052 = vmatmul.mubr.bf16.gmra.mrb[24].mxu0 %v252_v51 }
  0xb1   : > { %1055 = vmatprep.mubr.bf16.mxu0 %v253_v52 }
  0xb8   : > { %1056 = vmatmul.mubr.bf16.gmra.mrb[28].mxu0 %v254_v55 }
  0xb9   : > { %550 = vmatprep.mubr.bf16.mxu0 %v471_v59 }
 0x153   : > { %v1029_v57 = vpop.f32.mrb[0].mxu0 }
 0x154   : > { %v343_v60 = vpop.f32.mrb[1].mxu0  ;;  %v352_v62 = vadd.f32 %v1029_v57, %v1383_v58 }
 0x155   : > { %v1030_v61 = vpop.f32.mrb[2].mxu0  ;;  %v344_v1 = vadd.f32 %v1383_v58, %v343_v60 }
 0x156   : > { %v355_v63 = vadd.f32 %v1030_v61, %v1383_v58  ;;  %v346_v0 = vpop.f32.mrb[3].mxu0 }
 0x157   : > { %v347_v2 = vadd.f32 %v1383_v58, %v346_v0 }
 0x158   : > { %v503_v3 = vpack.c.bf16 %v355_v63, %v352_v62 }
 0x159   : > { %v502_v4 = vpack.c.bf16 %v347_v2, %v344_v1 }
 0x15b   : > { %v1033_v5 = vpop.f32.mrb[4].mxu0 }
 0x15c   : > { %v359_v6 = vpop.f32.mrb[5].mxu0  ;;  %v368_v8 = vadd.f32 %v1033_v5, %v1383_v58 }
 0x15d   : > { %v1034_v7 = vpop.f32.mrb[6].mxu0  ;;  %v360_v11 = vadd.f32 %v1383_v58, %v359_v6 }
 0x15e   : > { %v371_v9 = vadd.f32 %v1034_v7, %v1383_v58  ;;  %v362_v10 = vpop.f32.mrb[7].mxu0 }
 0x15f   : > { %v363_v12 = vadd.f32 %v1383_v58, %v362_v10 }
 0x160   : > { %v1393_v13 = vpack.c.bf16 %v371_v9, %v368_v8 }
 0x161   : > { %v504_v14 = vpack.c.bf16 %v363_v12, %v360_v11  ;;  %v478_v12 = vld [vmem:[#allocation2 + $0x40] sm:$0xff] }
 0x163   : > { %v1037_v15 = vpop.f32.mrb[8].mxu0 }
 0x164   : > { %v375_v16 = vpop.f32.mrb[9].mxu0  ;;  %v384_v18 = vadd.f32 %v1037_v15, %v1383_v58  ;;  %v480_v15 = vld [vmem:[#allocation2 + $0x50] sm:$0xff] }
 0x165   : > { %v1038_v17 = vpop.f32.mrb[10].mxu0  ;;  %v376_v21 = vadd.f32 %v1383_v58, %v375_v16  ;;  %v472_v16 = vld [vmem:[#allocation2 + $0x10] sm:$0xff] }
 0x166   : > { %v387_v19 = vadd.f32 %v1038_v17, %v1383_v58  ;;  %v378_v20 = vpop.f32.mrb[11].mxu0  ;;  %v483_v17 = vld [vmem:[#allocation2 + $0x68] sm:$0xff] }
 0x167   : > { %v379_v22 = vadd.f32 %v1383_v58, %v378_v20  ;;  %v474_v20 = vld [vmem:[#allocation2 + $0x20] sm:$0xff] }
 0x168   : > { %v1399_v23 = vpack.c.bf16 %v387_v19, %v384_v18  ;;  %v475_v18 = vld [vmem:[#allocation2 + $0x28] sm:$0xff]  ;;  %v482_v19 = vld [vmem:[#allocation2 + $0x60] sm:$0xff] }
 0x169   : > { %v506_v24 = vpack.c.bf16 %v379_v22, %v376_v21  ;;  %v485_v21 = vld [vmem:[#allocation2 + $0x78] sm:$0xff] }
 0x16a   : > { %v477_v22 = vld [vmem:[#allocation2 + $0x38] sm:$0xff] }
 0x16b   : > { %v1041_v25 = vpop.f32.mrb[12].mxu0 }
 0x16c   : > { %v391_v26 = vpop.f32.mrb[13].mxu0  ;;  %v400_v28 = vadd.f32 %v1041_v25, %v1383_v58  ;;  %v487_v25 = vld [vmem:[#allocation2 + $0x88] sm:$0xff] }
 0x16d   : > { %v1042_v27 = vpop.f32.mrb[14].mxu0  ;;  %v392_v31 = vadd.f32 %v1383_v58, %v391_v26  ;;  %v486_v26 = vld [vmem:[#allocation2 + $0x80] sm:$0xff] }
 0x16e   : > { %v403_v29 = vadd.f32 %v1042_v27, %v1383_v58  ;;  %v394_v30 = vpop.f32.mrb[15].mxu0  ;;  %v489_v27 = vld [vmem:[#allocation2 + $0x98] sm:$0xff] }
 0x16f   : > { %v395_v32 = vadd.f32 %v1383_v58, %v394_v30  ;;  %v490_v30 = vld [vmem:[#allocation2 + $0xa0] sm:$0xff] }
 0x170   : > { %v1405_v33 = vpack.c.bf16 %v403_v29, %v400_v28  ;;  %v488_v28 = vld [vmem:[#allocation2 + $0x90] sm:$0xff]  ;;  %v491_v29 = vld [vmem:[#allocation2 + $0xa8] sm:$0xff] }
 0x171   : > { %v1407_v34 = vpack.c.bf16 %v395_v32, %v392_v31  ;;  %v493_v31 = vld [vmem:[#allocation2 + $0xb8] sm:$0xff]  ;;  %v492_v32 = vld [vmem:[#allocation2 + $0xb0] sm:$0xff] }
 0x173   : > { %v1045_v35 = vpop.f32.mrb[16].mxu0 }
 0x174   : > { %v407_v36 = vpop.f32.mrb[17].mxu0  ;;  %v416_v38 = vadd.f32 %v1045_v35, %v1383_v58  ;;  %v497_v35 = vld [vmem:[#allocation2 + $0xd8] sm:$0xff] }
 0x175   : > { %v1046_v37 = vpop.f32.mrb[18].mxu0  ;;  %v408_v41 = vadd.f32 %v1383_v58, %v407_v36  ;;  %v496_v36 = vld [vmem:[#allocation2 + $0xd0] sm:$0xff] }
 0x176   : > { %v419_v39 = vadd.f32 %v1046_v37, %v1383_v58  ;;  %v410_v40 = vpop.f32.mrb[19].mxu0  ;;  %v499_v37 = vld [vmem:[#allocation2 + $0xe8] sm:$0xff] }
 0x177   : > { %v411_v42 = vadd.f32 %v1383_v58, %v410_v40  ;;  %v500_v40 = vld [vmem:[#allocation2 + $0xf0] sm:$0xff] }
 0x178   : > { %v511_v43 = vpack.c.bf16 %v419_v39, %v416_v38  ;;  %v498_v38 = vld [vmem:[#allocation2 + $0xe0] sm:$0xff]  ;;  %v501_v39 = vld [vmem:[#allocation2 + $0xf8] sm:$0xff] }
 0x179   : > { %v510_v44 = vpack.c.bf16 %v411_v42, %v408_v41 }
 0x17b   : > { %v1049_v45 = vpop.f32.mrb[20].mxu0  ;;  %899 = vmatprep.subr.bf16.mxu0 %v510_v44  ;;  %1059 = vmatprep.subr.bf16.mxu1 %v510_v44 }
 0x17c   : > { %v423_v46 = vpop.f32.mrb[21].mxu0  ;;  %900 = vmatpush3.bf16.msra.mxu0 %v502_v4  ;;  %1067 = vmatpush3.bf16.msra.mxu1 %v502_v4  ;;  %v432_v48 = vadd.f32 %v1049_v45, %v1383_v58 }
 0x17d   : > { %v1050_v47 = vpop.f32.mrb[22].mxu0  ;;  %901 = vmatprep.subr.bf16.mxu0 %v511_v43  ;;  %1060 = vmatprep.subr.bf16.mxu1 %v511_v43  ;;  %v424_v51 = vadd.f32 %v1383_v58, %v423_v46 }
 0x17e   : > { %v435_v49 = vadd.f32 %v1050_v47, %v1383_v58  ;;  %v426_v50 = vpop.f32.mrb[23].mxu0 }
 0x17f   : > { %v427_v52 = vadd.f32 %v1383_v58, %v426_v50 }
 0x180   : > { %v513_v53 = vpack.c.bf16 %v435_v49, %v432_v48  ;;  %902 = vmatpush3.bf16.msra.mxu0 %v503_v3  ;;  %1068 = vmatpush3.bf16.msra.mxu1 %v503_v3 }
 0x181   : > { %v512_v54 = vpack.c.bf16 %v427_v52, %v424_v51 }
 0x183   : > { %v1053_v55 = vpop.f32.mrb[24].mxu0  ;;  %903 = vmatprep.subr.bf16.mxu0 %v512_v54  ;;  %1061 = vmatprep.subr.bf16.mxu1 %v512_v54 }
 0x184   : > { %v439_v56 = vpop.f32.mrb[25].mxu0  ;;  %904 = vmatpush3.bf16.msra.mxu0 %v504_v14  ;;  %1069 = vmatpush3.bf16.msra.mxu1 %v504_v14  ;;  %v448_v59 = vadd.f32 %v1053_v55, %v1383_v58  ;;  %v473_v14 = vld [vmem:[#allocation2 + $0x18] sm:$0xff] }
 0x185   : > { %v1054_v57 = vpop.f32.mrb[26].mxu0  ;;  %905 = vmatprep.subr.bf16.mxu0 %v513_v53  ;;  %1062 = vmatprep.subr.bf16.mxu1 %v513_v53  ;;  %v440_v62 = vadd.f32 %v1383_v58, %v439_v56 }
 0x186   : > { %v451_v60 = vadd.f32 %v1054_v57, %v1383_v58  ;;  %v442_v61 = vpop.f32.mrb[27].mxu0 }
 0x187   : > { %v443_v63 = vadd.f32 %v1383_v58, %v442_v61 }
 0x188   : > { %v515_v0 = vpack.c.bf16 %v451_v60, %v448_v59  ;;  %906 = vmatpush3.bf16.msra.mxu0 %v1393_v13  ;;  %1070 = vmatpush3.bf16.msra.mxu1 %v1393_v13  ;;  %v481_v13 = vld [vmem:[#allocation2 + $0x58] sm:$0xff] }
 0x189   : > { %v514_v1 = vpack.c.bf16 %v443_v63, %v440_v62 }
 0x18b   : > { %v1057_v2 = vpop.f32.mrb[28].mxu0  ;;  %907 = vmatprep.subr.bf16.mxu0 %v514_v1  ;;  %1063 = vmatprep.subr.bf16.mxu1 %v514_v1 }
 0x18c   : > { %v455_v3 = vpop.f32.mrb[29].mxu0  ;;  %908 = vmatpush3.bf16.msra.mxu0 %v506_v24  ;;  %1071 = vmatpush3.bf16.msra.mxu1 %v506_v24  ;;  %v464_v5 = vadd.f32 %v1057_v2, %v1383_v58  ;;  %v476_v24 = vld [vmem:[#allocation2 + $0x30] sm:$0xff] }
 0x18d   : > { %v1058_v4 = vpop.f32.mrb[30].mxu0  ;;  %909 = vmatprep.subr.bf16.mxu0 %v515_v0  ;;  %1064 = vmatprep.subr.bf16.mxu1 %v515_v0  ;;  %v456_v8 = vadd.f32 %v1383_v58, %v455_v3 }
 0x18e   : > { %v467_v6 = vadd.f32 %v1058_v4, %v1383_v58  ;;  %v458_v7 = vpop.f32.mrb[31].mxu0 }
 0x18f   : > { %v459_v9 = vadd.f32 %v1383_v58, %v458_v7  ;;  %v470_v58 = vld [vmem:[#allocation2] sm:$0xff] }
 0x190   : > { %v517_v10 = vpack.c.bf16 %v467_v6, %v464_v5  ;;  %910 = vmatpush3.bf16.msra.mxu0 %v1399_v23  ;;  %1072 = vmatpush3.bf16.msra.mxu1 %v1399_v23  ;;  %v484_v23 = vld [vmem:[#allocation2 + $0x70] sm:$0xff] }
 0x191   : > { %v516_v11 = vpack.c.bf16 %v459_v9, %v456_v8 }
 0x193   : > { %911 = vmatprep.subr.bf16.mxu0 %v516_v11  ;;  %1065 = vmatprep.subr.bf16.mxu1 %v516_v11 }
 0x194   : > { %912 = vmatpush3.bf16.msra.mxu0 %v1407_v34  ;;  %1073 = vmatpush3.bf16.msra.mxu1 %v1407_v34  ;;  %v494_v34 = vld [vmem:[#allocation2 + $0xc0] sm:$0xff] }
 0x195   : > { %913 = vmatprep.subr.bf16.mxu0 %v517_v10  ;;  %1066 = vmatprep.subr.bf16.mxu1 %v517_v10 }
 0x198   : > { %914 = vmatpush3.bf16.msra.mxu0 %v1405_v33  ;;  %1074 = vmatpush3.bf16.msra.mxu1 %v1405_v33  ;;  %v495_v33 = vld [vmem:[#allocation2 + $0xc8] sm:$0xff] }
 0x19b   : > { %583 = vmatmul.mubr.bf16.vlgmr.msra.gmra.mrb[0].mxu1 %v478_v12  ;;  %551 = vmatmul.mubr.bf16.vlgmr.msra.gmra.mrb[32].mxu0 %v470_v58 }
 0x19c   : > { %590 = vmatprep.mubr.bf16.mxu1 %v481_v13  ;;  %558 = vmatprep.mubr.bf16.mxu0 %v473_v14 }
 0x1a3   : > { %591 = vmatmul.mubr.bf16.gmra.mrb[4].mxu1 %v480_v15  ;;  %559 = vmatmul.mubr.bf16.gmra.mrb[36].mxu0 %v472_v16 }
 0x1a4   : > { %598 = vmatprep.mubr.bf16.mxu1 %v483_v17  ;;  %566 = vmatprep.mubr.bf16.mxu0 %v475_v18 }
 0x1ab   : > { %599 = vmatmul.mubr.bf16.gmra.mrb[8].mxu1 %v482_v19  ;;  %567 = vmatmul.mubr.bf16.gmra.mrb[40].mxu0 %v474_v20 }
 0x1ac   : > { %606 = vmatprep.mubr.bf16.mxu1 %v485_v21  ;;  %574 = vmatprep.mubr.bf16.mxu0 %v477_v22 }
 0x1b3   : > { %607 = vmatmul.mubr.bf16.gmra.mrb[12].mxu1 %v484_v23  ;;  %575 = vmatmul.mubr.bf16.gmra.mrb[44].mxu0 %v476_v24 }
 0x1b4   : > { %614 = vmatprep.mubr.bf16.mxu1 %v487_v25 }
 0x1bb   : > { %615 = vmatmul.mubr.bf16.gmra.mrb[16].mxu1 %v486_v26 }
 0x1bc   : > { %622 = vmatprep.mubr.bf16.mxu1 %v489_v27 }
 0x1c3   : > { %623 = vmatmul.mubr.bf16.gmra.mrb[20].mxu1 %v488_v28 }
 0x1c4   : > { %630 = vmatprep.mubr.bf16.mxu1 %v491_v29 }
 0x1cb   : > { %631 = vmatmul.mubr.bf16.gmra.mrb[24].mxu1 %v490_v30 }
 0x1cc   : > { %638 = vmatprep.mubr.bf16.mxu1 %v493_v31 }
 0x1d3   : > { %639 = vmatmul.mubr.bf16.gmra.mrb[28].mxu1 %v492_v32 }
 0x1d4   : > { %646 = vmatprep.mubr.bf16.mxu1 %v495_v33 }
 0x1db   : > { %647 = vmatmul.mubr.bf16.gmra.mrb[32].mxu1 %v494_v34 }
 0x1dc   : > { %654 = vmatprep.mubr.bf16.mxu1 %v497_v35 }
 0x1e3   : > { %655 = vmatmul.mubr.bf16.gmra.mrb[36].mxu1 %v496_v36 }
 0x1e4   : > { %662 = vmatprep.mubr.bf16.mxu1 %v499_v37 }
 0x1eb   : > { %663 = vmatmul.mubr.bf16.gmra.mrb[40].mxu1 %v498_v38 }
 0x1ec   : > { %670 = vmatprep.mubr.bf16.mxu1 %v501_v39 }
 0x1f3   : > { %671 = vmatmul.mubr.bf16.gmra.mrb[44].mxu1 %v500_v40 }
 0x26e   : > { %v939_v41 = vpop.f32.mrb[0].mxu1  ;;  %v915_v42 = vpop.f32.mrb[32].mxu0 }
 0x26f   : > { %v940_v43 = vpop.f32.mrb[1].mxu1  ;;  %v916_v44 = vpop.f32.mrb[33].mxu0 }
 0x270   : > { %v1433_v45 = vadd.f32 %v940_v43, %v939_v41  ;;  %v942_v46 = vpop.f32.mrb[2].mxu1  ;;  %v1435_v47 = vadd.f32 %v916_v44, %v915_v42  ;;  %v918_v48 = vpop.f32.mrb[34].mxu0 }
 0x271   : > { %v943_v49 = vpop.f32.mrb[3].mxu1  ;;  %v919_v50 = vpop.f32.mrb[35].mxu0 }
 0x272   : > { %v1437_v51 = vadd.f32 %v943_v49, %v942_v46  ;;  %v1439_v52 = vadd.f32 %v919_v50, %v918_v48 }
 0x276   : > { %v945_v53 = vpop.f32.mrb[4].mxu1  ;;  %v921_v54 = vpop.f32.mrb[36].mxu0 }
 0x277   : > { %v946_v55 = vpop.f32.mrb[5].mxu1  ;;  %v922_v56 = vpop.f32.mrb[37].mxu0 }
 0x278   : > { %v1441_v57 = vadd.f32 %v946_v55, %v945_v53  ;;  %v948_v59 = vpop.f32.mrb[6].mxu1  ;;  %v1443_v60 = vadd.f32 %v922_v56, %v921_v54  ;;  %v924_v61 = vpop.f32.mrb[38].mxu0 }
 0x279   : > { %v949_v62 = vpop.f32.mrb[7].mxu1  ;;  %v925_v63 = vpop.f32.mrb[39].mxu0 }
 0x27a   : > { %v1445_v0 = vadd.f32 %v949_v62, %v948_v59  ;;  %v1447_v1 = vadd.f32 %v925_v63, %v924_v61 }
 0x27e   : > { %v951_v2 = vpop.f32.mrb[8].mxu1  ;;  %v927_v3 = vpop.f32.mrb[40].mxu0 }
 0x27f   : > { %v952_v4 = vpop.f32.mrb[9].mxu1  ;;  %v928_v5 = vpop.f32.mrb[41].mxu0 }
 0x280   : > { %v1449_v6 = vadd.f32 %v952_v4, %v951_v2  ;;  %v954_v7 = vpop.f32.mrb[10].mxu1  ;;  %v1451_v8 = vadd.f32 %v928_v5, %v927_v3  ;;  %v930_v9 = vpop.f32.mrb[42].mxu0 }
 0x281   : > { %v955_v10 = vpop.f32.mrb[11].mxu1  ;;  %v931_v11 = vpop.f32.mrb[43].mxu0 }
 0x282   : > { %v1453_v12 = vadd.f32 %v955_v10, %v954_v7  ;;  %v1455_v58 = vadd.f32 %v931_v11, %v930_v9 }
 0x286   : > { %v957_v13 = vpop.f32.mrb[12].mxu1  ;;  %v933_v14 = vpop.f32.mrb[44].mxu0 }
 0x287   : > { %v958_v15 = vpop.f32.mrb[13].mxu1  ;;  %v934_v16 = vpop.f32.mrb[45].mxu0 }
 0x288   : > { %v1457_v17 = vadd.f32 %v958_v15, %v957_v13  ;;  %v960_v18 = vpop.f32.mrb[14].mxu1  ;;  %v1459_v19 = vadd.f32 %v934_v16, %v933_v14  ;;  %v936_v20 = vpop.f32.mrb[46].mxu0 }
 0x289   : > { %v961_v21 = vpop.f32.mrb[15].mxu1  ;;  %v937_v22 = vpop.f32.mrb[47].mxu0 }
 0x28a   : > { %v1461_v23 = vadd.f32 %v961_v21, %v960_v18  ;;  %v1463_v24 = vadd.f32 %v937_v22, %v936_v20 }
 0x28e   : > { %v963_v25 = vpop.f32.mrb[16].mxu1 }
 0x28f   : > { %v964_v26 = vpop.f32.mrb[17].mxu1 }
 0x290   : > { %v1465_v27 = vadd.f32 %v964_v26, %v963_v25  ;;  %v966_v28 = vpop.f32.mrb[18].mxu1  ;;  %v683_v25 = vmax.f32 (!%p866_p5), %v1435_v47, 0.0  ;;  %v684_v26 = vmax.f32 (!%p866_p5), %v1439_v52, 0.0 }
 0x291   : > { %v967_v29 = vpop.f32.mrb[19].mxu1 }
 0x292   : > { %v1467_v30 = vadd.f32 %v967_v29, %v966_v28  ;;  %v685_v28 = vmax.f32 (!%p866_p5), %v1443_v60, 0.0  ;;  %v686_v29 = vmax.f32 (!%p866_p5), %v1447_v1, 0.0  ;;  %715 = vst [vmem:[#allocation3] sm:$0xff] (!%p866_p5), %v683_v25  ;;  %716 = vst [vmem:[#allocation3 + $0x8] sm:$0xff] (!%p866_p5), %v684_v26 }
 0x294   : > { %717 = vst [vmem:[#allocation3 + $0x10] sm:$0xff] (!%p866_p5), %v685_v28  ;;  %718 = vst [vmem:[#allocation3 + $0x18] sm:$0xff] (!%p866_p5), %v686_v29 }
 0x296   : > { %v969_v31 = vpop.f32.mrb[20].mxu1 }
 0x297   : > { %v970_v32 = vpop.f32.mrb[21].mxu1 }
 0x298   : > { %v1469_v33 = vadd.f32 %v970_v32, %v969_v31  ;;  %v972_v34 = vpop.f32.mrb[22].mxu1  ;;  %v687_v31 = vmax.f32 (!%p866_p5), %v1451_v8, 0.0  ;;  %v688_v32 = vmax.f32 (!%p866_p5), %v1455_v58, 0.0 }
 0x299   : > { %v973_v35 = vpop.f32.mrb[23].mxu1 }
 0x29a   : > { %v1471_v36 = vadd.f32 %v973_v35, %v972_v34  ;;  %v689_v34 = vmax.f32 (!%p866_p5), %v1459_v19, 0.0  ;;  %v690_v35 = vmax.f32 (!%p866_p5), %v1463_v24, 0.0  ;;  %719 = vst [vmem:[#allocation3 + $0x20] sm:$0xff] (!%p866_p5), %v687_v31  ;;  %720 = vst [vmem:[#allocation3 + $0x28] sm:$0xff] (!%p866_p5), %v688_v32 }
 0x29c   : > { %721 = vst [vmem:[#allocation3 + $0x30] sm:$0xff] (!%p866_p5), %v689_v34  ;;  %722 = vst [vmem:[#allocation3 + $0x38] sm:$0xff] (!%p866_p5), %v690_v35 }
 0x29e   : > { %v975_v37 = vpop.f32.mrb[24].mxu1 }
 0x29f   : > { %v976_v38 = vpop.f32.mrb[25].mxu1 }
 0x2a0   : > { %v1473_v39 = vadd.f32 %v976_v38, %v975_v37  ;;  %v978_v40 = vpop.f32.mrb[26].mxu1  ;;  %v691_v37 = vmax.f32 (!%p866_p5), %v1433_v45, 0.0  ;;  %v692_v38 = vmax.f32 (!%p866_p5), %v1437_v51, 0.0 }
 0x2a1   : > { %v979_v41 = vpop.f32.mrb[27].mxu1 }
 0x2a2   : > { %v1475_v42 = vadd.f32 %v979_v41, %v978_v40  ;;  %v693_v40 = vmax.f32 (!%p866_p5), %v1441_v57, 0.0  ;;  %v694_v41 = vmax.f32 (!%p866_p5), %v1445_v0, 0.0  ;;  %723 = vst [vmem:[#allocation3 + $0x40] sm:$0xff] (!%p866_p5), %v691_v37  ;;  %724 = vst [vmem:[#allocation3 + $0x48] sm:$0xff] (!%p866_p5), %v692_v38 }
 0x2a4   : > { %725 = vst [vmem:[#allocation3 + $0x50] sm:$0xff] (!%p866_p5), %v693_v40  ;;  %726 = vst [vmem:[#allocation3 + $0x58] sm:$0xff] (!%p866_p5), %v694_v41 }
 0x2a6   : > { %v981_v43 = vpop.f32.mrb[28].mxu1 }
 0x2a7   : > { %v982_v44 = vpop.f32.mrb[29].mxu1 }
 0x2a8   : > { %v1477_v46 = vadd.f32 %v982_v44, %v981_v43  ;;  %v984_v48 = vpop.f32.mrb[30].mxu1  ;;  %v695_v43 = vmax.f32 (!%p866_p5), %v1449_v6, 0.0  ;;  %v696_v44 = vmax.f32 (!%p866_p5), %v1453_v12, 0.0 }
 0x2a9   : > { %v985_v49 = vpop.f32.mrb[31].mxu1 }
 0x2aa   : > { %v1479_v50 = vadd.f32 %v985_v49, %v984_v48  ;;  %v697_v48 = vmax.f32 (!%p866_p5), %v1457_v17, 0.0  ;;  %v698_v49 = vmax.f32 (!%p866_p5), %v1461_v23, 0.0  ;;  %727 = vst [vmem:[#allocation3 + $0x60] sm:$0xff] (!%p866_p5), %v695_v43  ;;  %728 = vst [vmem:[#allocation3 + $0x68] sm:$0xff] (!%p866_p5), %v696_v44 }
 0x2ac   : > { %729 = vst [vmem:[#allocation3 + $0x70] sm:$0xff] (!%p866_p5), %v697_v48  ;;  %730 = vst [vmem:[#allocation3 + $0x78] sm:$0xff] (!%p866_p5), %v698_v49 }
 0x2ae   : > { %v987_v53 = vpop.f32.mrb[32].mxu1 }
 0x2af   : > { %v988_v54 = vpop.f32.mrb[33].mxu1 }
 0x2b0   : > { %v1481_v55 = vadd.f32 %v988_v54, %v987_v53  ;;  %v990_v56 = vpop.f32.mrb[34].mxu1  ;;  %v699_v53 = vmax.f32 (!%p866_p5), %v1465_v27, 0.0  ;;  %v700_v54 = vmax.f32 (!%p866_p5), %v1467_v30, 0.0 }
 0x2b1   : > { %v991_v59 = vpop.f32.mrb[35].mxu1 }
 0x2b2   : > { %v1483_v61 = vadd.f32 %v991_v59, %v990_v56  ;;  %v701_v56 = vmax.f32 (!%p866_p5), %v1469_v33, 0.0  ;;  %v702_v59 = vmax.f32 (!%p866_p5), %v1471_v36, 0.0  ;;  %731 = vst [vmem:[#allocation3 + $0x80] sm:$0xff] (!%p866_p5), %v699_v53  ;;  %732 = vst [vmem:[#allocation3 + $0x88] sm:$0xff] (!%p866_p5), %v700_v54 }
 0x2b4   : > { %733 = vst [vmem:[#allocation3 + $0x90] sm:$0xff] (!%p866_p5), %v701_v56  ;;  %734 = vst [vmem:[#allocation3 + $0x98] sm:$0xff] (!%p866_p5), %v702_v59 }
 0x2b6   : > { %v993_v62 = vpop.f32.mrb[36].mxu1 }
 0x2b7   : > { %v994_v63 = vpop.f32.mrb[37].mxu1 }
 0x2b8   : > { %v1485_v2 = vadd.f32 %v994_v63, %v993_v62  ;;  %v996_v3 = vpop.f32.mrb[38].mxu1  ;;  %v703_v62 = vmax.f32 (!%p866_p5), %v1473_v39, 0.0  ;;  %v704_v63 = vmax.f32 (!%p866_p5), %v1475_v42, 0.0 }
 0x2b9   : > { %v997_v4 = vpop.f32.mrb[39].mxu1 }
 0x2ba   : > { %v1487_v5 = vadd.f32 %v997_v4, %v996_v3  ;;  %v705_v3 = vmax.f32 (!%p866_p5), %v1477_v46, 0.0  ;;  %v706_v4 = vmax.f32 (!%p866_p5), %v1479_v50, 0.0  ;;  %735 = vst [vmem:[#allocation3 + $0xa0] sm:$0xff] (!%p866_p5), %v703_v62  ;;  %736 = vst [vmem:[#allocation3 + $0xa8] sm:$0xff] (!%p866_p5), %v704_v63 }
 0x2bc   : > { %737 = vst [vmem:[#allocation3 + $0xb0] sm:$0xff] (!%p866_p5), %v705_v3  ;;  %738 = vst [vmem:[#allocation3 + $0xb8] sm:$0xff] (!%p866_p5), %v706_v4 }
 0x2be   : > { %v999_v7 = vpop.f32.mrb[40].mxu1 }
 0x2bf   : > { %v1000_v9 = vpop.f32.mrb[41].mxu1 }
 0x2c0   : > { %v1489_v10 = vadd.f32 %v1000_v9, %v999_v7  ;;  %v1002_v11 = vpop.f32.mrb[42].mxu1  ;;  %v707_v7 = vmax.f32 (!%p866_p5), %v1481_v55, 0.0  ;;  %v708_v9 = vmax.f32 (!%p866_p5), %v1483_v61, 0.0 }
 0x2c1   : > { %v1003_v13 = vpop.f32.mrb[43].mxu1 }
 0x2c2   : > { %v1491_v14 = vadd.f32 %v1003_v13, %v1002_v11  ;;  %v709_v11 = vmax.f32 (!%p866_p5), %v1485_v2, 0.0  ;;  %v710_v13 = vmax.f32 (!%p866_p5), %v1487_v5, 0.0  ;;  %739 = vst [vmem:[#allocation3 + $0xc0] sm:$0xff] (!%p866_p5), %v707_v7  ;;  %740 = vst [vmem:[#allocation3 + $0xc8] sm:$0xff] (!%p866_p5), %v708_v9 }
 0x2c4   : > { %682 = sbr.rel (%p866_p5) target bundleno = 719 (0x2cf), region = 44  ;;  %741 = vst [vmem:[#allocation3 + $0xd0] sm:$0xff] (!%p866_p5), %v709_v11  ;;  %742 = vst [vmem:[#allocation3 + $0xd8] sm:$0xff] (!%p866_p5), %v710_v13 }
 0x2c6   : > { %v1005_v15 = vpop.f32.mrb[44].mxu1 }
 0x2c7   : > { %v1006_v16 = vpop.f32.mrb[45].mxu1 }
 0x2c8   : > { %v1493_v18 = vadd.f32 %v1006_v16, %v1005_v15  ;;  %v1008_v20 = vpop.f32.mrb[46].mxu1  ;;  %v711_v15 = vmax.f32 (!%p866_p5), %v1489_v10, 0.0  ;;  %v712_v16 = vmax.f32 (!%p866_p5), %v1491_v14, 0.0 }
 0x2c9   : > { %v1009_v21 = vpop.f32.mrb[47].mxu1 }
 0x2ca   : > { %v1495_v22 = vadd.f32 %v1009_v21, %v1008_v20  ;;  %v713_v20 = vmax.f32 (!%p866_p5), %v1493_v18, 0.0  ;;  %743 = vst [vmem:[#allocation3 + $0xe0] sm:$0xff] (!%p866_p5), %v711_v15  ;;  %744 = vst [vmem:[#allocation3 + $0xe8] sm:$0xff] (!%p866_p5), %v712_v16 }
 0x2cc   : > { %v714_v21 = vmax.f32 %v1495_v22, 0.0  ;;  %745 = vst [vmem:[#allocation3 + $0xf0] sm:$0xff] %v713_v20 }
 0x2ce   : > { %746 = vst [vmem:[#allocation3 + $0xf8] sm:$0xff] %v714_v21 }
 0x2cf PF: > { %p867_p9 = scmp.ne.s32.totalorder %s1288_s16, 5 }
 0x2d0   : > { %751 = vst [vmem:[#allocation8] sm:$0xff] (!%p867_p9), %v1435_v47  ;;  %752 = vst [vmem:[#allocation8 + $0x8] sm:$0xff] (!%p867_p9), %v1439_v52 }
 0x2d1   : > { %750 = sbr.rel (%p867_p9) target bundleno = 736 (0x2e0), region = 48  ;;  %753 = vst [vmem:[#allocation8 + $0x10] sm:$0xff] (!%p867_p9), %v1443_v60  ;;  %754 = vst [vmem:[#allocation8 + $0x18] sm:$0xff] (!%p867_p9), %v1447_v1 }
 0x2d2   : > { %755 = vst [vmem:[#allocation8 + $0x20] sm:$0xff] (!%p867_p9), %v1451_v8  ;;  %756 = vst [vmem:[#allocation8 + $0x28] sm:$0xff] (!%p867_p9), %v1455_v58 }
 0x2d3   : > { %757 = vst [vmem:[#allocation8 + $0x30] sm:$0xff] (!%p867_p9), %v1459_v19  ;;  %758 = vst [vmem:[#allocation8 + $0x38] sm:$0xff] (!%p867_p9), %v1463_v24 }
 0x2d4   : > { %759 = vst [vmem:[#allocation8 + $0x40] sm:$0xff] (!%p867_p9), %v1433_v45  ;;  %760 = vst [vmem:[#allocation8 + $0x48] sm:$0xff] (!%p867_p9), %v1437_v51 }
 0x2d5   : > { %761 = vst [vmem:[#allocation8 + $0x50] sm:$0xff] (!%p867_p9), %v1441_v57  ;;  %762 = vst [vmem:[#allocation8 + $0x58] sm:$0xff] (!%p867_p9), %v1445_v0 }
 0x2d6   : > { %763 = vst [vmem:[#allocation8 + $0x60] sm:$0xff] (!%p867_p9), %v1449_v6  ;;  %764 = vst [vmem:[#allocation8 + $0x68] sm:$0xff] (!%p867_p9), %v1453_v12 }
 0x2d7   : > { %765 = vst [vmem:[#allocation8 + $0x70] sm:$0xff] (!%p867_p9), %v1457_v17  ;;  %766 = vst [vmem:[#allocation8 + $0x78] sm:$0xff] (!%p867_p9), %v1461_v23 }
 0x2d8   : > { %767 = vst [vmem:[#allocation8 + $0x80] sm:$0xff] %v1465_v27  ;;  %768 = vst [vmem:[#allocation8 + $0x88] sm:$0xff] %v1467_v30 }
 0x2d9   : > { %769 = vst [vmem:[#allocation8 + $0x90] sm:$0xff] %v1469_v33  ;;  %770 = vst [vmem:[#allocation8 + $0x98] sm:$0xff] %v1471_v36 }
 0x2da   : > { %771 = vst [vmem:[#allocation8 + $0xa0] sm:$0xff] %v1473_v39  ;;  %772 = vst [vmem:[#allocation8 + $0xa8] sm:$0xff] %v1475_v42 }
 0x2db   : > { %773 = vst [vmem:[#allocation8 + $0xb0] sm:$0xff] %v1477_v46  ;;  %774 = vst [vmem:[#allocation8 + $0xb8] sm:$0xff] %v1479_v50 }
 0x2dc   : > { %775 = vst [vmem:[#allocation8 + $0xc0] sm:$0xff] %v1481_v55  ;;  %776 = vst [vmem:[#allocation8 + $0xc8] sm:$0xff] %v1483_v61 }
 0x2dd   : > { %777 = vst [vmem:[#allocation8 + $0xd0] sm:$0xff] %v1485_v2  ;;  %778 = vst [vmem:[#allocation8 + $0xd8] sm:$0xff] %v1487_v5 }
 0x2de   : > { %779 = vst [vmem:[#allocation8 + $0xe0] sm:$0xff] %v1489_v10  ;;  %780 = vst [vmem:[#allocation8 + $0xe8] sm:$0xff] %v1491_v14 }
 0x2df   : > { %781 = vst [vmem:[#allocation8 + $0xf0] sm:$0xff] %v1493_v18  ;;  %782 = vst [vmem:[#allocation8 + $0xf8] sm:$0xff] %v1495_v22 }
 0x2e0 PF: > { %p1105_p10 = scmp.eq.s32.totalorder %s1288_s16, 5  ;;  %s1254_s17 = smov [#allocation8]  }
 0x2e1   : > { %s789_s18 = sshll.u32 %s1254_s17, 4  ;;  %s790_s18 = int_to_ptr.vmem [resolvable:$true] %s789_s18 }
 0x2e2   : > { %s1192_s19 = scalar_lea.vmem %s790_s18, 4096  ;;  %p1199_p0 = scmp.lt.s32.totalorder %s790_s18, %s790_s18 }
 0x2e3   : > { %p1193_p11 = scmp.ne.s32.totalorder %s790_s18, %s1192_s19  ;;  %p1200_p1 = scmp.lt.s32.totalorder %s1192_s19, %s1192_s19 }
 0x2e5   : > { %p1194_p12 = pnand %p1193_p11, %p1105_p10  ;;  %p1201_p4 = por %p1200_p1, %p1199_p0 }
 0x2e7   : > { %p1195_p13 = pneg %p1194_p12 }
 0x2e9   : > { %p1202_p6 = pnand %p1201_p4, %p1195_p13 }
 0x2eb   : > { %1205 = shalt.err (!%p1202_p6)
}
 0x2ec   : > { %s1206_s22 = scalar_lea.hbm %s1593_s4, 4096 }
 0x2ed   : > { %p1207_p8 = scmp.ne.s32.totalorder %s1593_s4, %s1206_s22  ;;  %p1212_p2 = scmp.lt.u32.totalorder %s1206_s22, %s1593_s4 }
 0x2ef   : > { %p1208_p7 = pnand %p1207_p8, %p1105_p10 }
 0x2f1   : > { %p1209_p3 = pneg %p1208_p7 }
 0x2f3   : > { %p1214_p5 = pnand %p1212_p2, %p1209_p3 }
 0x2f5   : > { %1217 = shalt.err (!%p1214_p5)
}
 0x2f6   : > { %s1255_s27 = smov 128   ;;  %s1256_s28 = smov 8  }
 0x2f7   : > { %1095 = dma.vmem_to_hbm [thread:$0]  (%p1105_p10), %s790_s18, 4096, %s1593_s4, [#allocation7], %s1255_s27, %s1255_s27, %s1256_s28  }
 0x2f8   : > { %1235 = dma.done.wait (%p1105_p10), [#allocation7], 4096  }
 0x2f9   : > { %1237 = vsyncadd (%p1105_p10), [#allocation7], 4294963200 }
 0x2fa PF: > { %s16_s15 = sadd.s32 1, %s1240_s15  }
 0x2fb   : > { %p13_p9 = scmp.ge.s32.totalorder %s16_s15, 8  }
 0x2fd   :  { %15 = sbr.rel (!%p13_p9) target bundleno = 2 (0x2), region = 85 }
 0x304   :  { %805 = vsyncpa [#allocation6], 1 }
 0x305   :  { %807 = vsyncpa [#allocation6 + $0x1], 1 }
 0x306   :  { %808 = vsyncpa [#allocation7], 1 }
 0x307   :  { %810 = vsyncpa [#allocation7 + $0x1], 1 }
 0x308   :  { %811 = vsyncmov [#allocation4] }
 0x30b   :  { %s812_s5 = vpop.sfrf %811 }
 0x30c   :  { %p872_p11 = scmp.ne.s32.totalorder %s812_s5, 0 }
 0x30e   :  { %816 = shalt.err (%p872_p11)  }
 0x30f   :  { %818 = vsyncmov [#allocation4 + $0x1] }
 0x312   :  { %s819_s6 = vpop.sfrf %818 }
 0x313   :  { %p873_p12 = scmp.ne.s32.totalorder %s819_s6, 0 }
 0x315   :  { %823 = shalt.err (%p873_p12)  }

</bundles_post_ra>
